<compile_context>
chip_gen: v5e
topology: v5e:2x2
jax: 0.10.0
libtpu: 0.0.40
codegen_flags: <defaults>
</compile_context>

<pallas_src>
import functools

import jax
import jax.numpy as jnp
from jax.experimental import pallas as pl
from jax.experimental.pallas import tpu as pltpu

_LANE = 128
_SUBLANE = 8


def _round_up(x, m):
    return ((x + m - 1) // m) * m


def _decoder_kernel(z_ref, w1_ref, b1_ref, w2_ref, b2_ref, w3_ref, b3_ref, o_ref):
    """Fused 3-layer MLP forward for one batch tile.

    z_ref : (TB, D_in)        VMEM, f32 (cast to weight dtype in-kernel)
    w*_ref: (D_prev, D_next)  VMEM, grid-invariant full weight (bf16 or f32)
    b*_ref: (1, D_next)       VMEM, f32
    o_ref : (TB, D_out_pad)   VMEM, f32, lane-padded

    Dots accumulate in f32 (preferred_element_type); bias add and ReLU run in
    f32; activations are cast back to the weight dtype only to feed the MXU.
    """
    z = z_ref[...].astype(w1_ref.dtype)  # in-kernel cast: VPU work hidden under MXU
    # Layer 1: Linear + ReLU
    h1 = jnp.dot(z, w1_ref[...], preferred_element_type=jnp.float32) + b1_ref[...]
    h1 = jnp.maximum(h1, 0.0).astype(w2_ref.dtype)
    # Layer 2: Linear + ReLU
    h2 = jnp.dot(h1, w2_ref[...], preferred_element_type=jnp.float32) + b2_ref[...]
    h2 = jnp.maximum(h2, 0.0).astype(w3_ref.dtype)
    # Layer 3: Linear (no activation on output, matching MLPNetwork)
    out = jnp.dot(h2, w3_ref[...], preferred_element_type=jnp.float32) + b3_ref[...]
    o_ref[...] = out.astype(o_ref.dtype)


def prepare_decoder_params(params, use_bf16=True):
    """One-time parameter preparation (do this OUTSIDE the per-step call).

    Casts weights to bf16 (MXU-native operands, f32 accumulation stays inside
    the kernel) and lane-pads w3/b3 so the last matmul / output store are
    lane-dense. Biases stay f32 (they are added to the f32 accumulator).

    Returns (prepared_params_dict, d_out).
    """
    op_dtype = jnp.bfloat16 if use_bf16 else jnp.float32
    d_out = params["w3"].shape[1]
    d_out_pad = _round_up(d_out, _LANE)
    w3 = params["w3"].astype(op_dtype)
    b3 = params["b3"].astype(jnp.float32)
    if d_out_pad != d_out:
        w3 = jnp.pad(w3, ((0, 0), (0, d_out_pad - d_out)))
        b3 = jnp.pad(b3, ((0, 0), (0, d_out_pad - d_out)))
    prepared = {
        "w1": params["w1"].astype(op_dtype), "b1": params["b1"].astype(jnp.float32),
        "w2": params["w2"].astype(op_dtype), "b2": params["b2"].astype(jnp.float32),
        "w3": w3, "b3": b3,
    }
    return prepared, d_out


def _default_batch_tile(B):
    """Generation-aware batch tile heuristic.

    - tiny B   : one tile (launch latency dominates; extra grid steps hurt).
    - mid B    : split into >=2 'parallel' steps so both v7x TensorCores get
                 work; the one extra ~0.35us step is noise on single-TC v5e/v6e.
    - large B  : 512-row tiles (multiple of 256 -> full MXU pushes, ~85% of HBM
                 roofline on v5e/v6e measured pipelines).
    """
    B8 = _round_up(B, _SUBLANE)
    if B8 <= 16:
        return B8
    return min(512, _round_up(-(-B8 // 2), _SUBLANE))


@functools.partial(jax.jit, static_argnames=("d_out", "batch_tile"))
def _decoder_forward_impl(z, w1, b1, w2, b2, w3, b3, *, d_out, batch_tile):
    B, d_in = z.shape
    h1 = w1.shape[1]
    h2 = w2.shape[1]
    d_out_pad = w3.shape[1]
    out_dtype = jnp.float32

    # ---- batch tiling (sublane-validated) ----
    if batch_tile is None:
        batch_tile = _default_batch_tile(B)
    else:
        batch_tile = _round_up(int(batch_tile), _SUBLANE)
    B_pad = _round_up(B, batch_tile)
    zp = jnp.pad(z, ((0, B_pad - B), (0, 0))) if B_pad != B else z
    grid = (B_pad // batch_tile,)

    # ---- advisory cost estimate (helps XLA schedule surrounding ops) ----
    flops = 2 * B_pad * (d_in * h1 + h1 * h2 + h2 * d_out_pad)
    weight_bytes = (w1.size + w2.size + w3.size) * w1.dtype.itemsize
    bias_bytes = (b1.size + b2.size + b3.size) * 4
    bytes_accessed = (B_pad * d_in * zp.dtype.itemsize
                      + weight_bytes + bias_bytes
                      + B_pad * d_out_pad * 4)
    cost = pl.CostEstimate(flops=flops, transcendentals=0,
                           bytes_accessed=bytes_accessed)

    # ---- VMEM budget: double-buffered inputs/outputs + f32 intermediates ----
    z_tile_bytes = batch_tile * d_in * zp.dtype.itemsize
    out_tile_bytes = batch_tile * d_out_pad * 4
    act_bytes = batch_tile * (h1 + h2 + d_out_pad) * 4
    needed = 2 * (weight_bytes + bias_bytes + z_tile_bytes + out_tile_bytes) + act_bytes
    vmem_limit = int(min(max(needed + (8 << 20), 32 << 20), 64 << 20))

    # Weights/biases are grid-invariant: full-array blocks, resident in VMEM.
    full = lambda shape: pl.BlockSpec(shape, lambda i: (0, 0))

    out = pl.pallas_call(
        _decoder_kernel,
        out_shape=jax.ShapeDtypeStruct((B_pad, d_out_pad), out_dtype),
        grid_spec=pltpu.PrefetchScalarGridSpec(
            num_scalar_prefetch=0,
            grid=grid,
            in_specs=[
                pl.BlockSpec((batch_tile, d_in), lambda i: (i, 0)),  # z tile (f32)
                full((d_in, h1)), full((1, h1)),
                full((h1, h2)), full((1, h2)),
                full((h2, d_out_pad)), full((1, d_out_pad)),
            ],
            out_specs=pl.BlockSpec((batch_tile, d_out_pad), lambda i: (i, 0)),
        ),
        compiler_params=pltpu.CompilerParams(
            dimension_semantics=("parallel",),
            vmem_limit_bytes=vmem_limit,
        ),
        cost_estimate=cost,
    )(zp, w1, b1, w2, b2, w3, b3)

    return out[:B, :d_out]


def decoder_forward(z, prepared_params, d_out, *, batch_tile=None):
    """Pallas forward pass of Decoder.

    z               : (B, D_in) float32
    prepared_params : output of prepare_decoder_params (bf16 weights, padded w3/b3)
    d_out           : true (unpadded) output feature count
    """
    p = prepared_params
    return _decoder_forward_impl(
        z, p["w1"], p["b1"], p["w2"], p["b2"], p["w3"], p["b3"],
        d_out=d_out, batch_tile=batch_tile)


def init_decoder_params(key, input_dim, output_dim, hidden_dims=(256, 256)):
    """Deterministic init matching nn.Linear default: U(-1/sqrt(fan_in), 1/sqrt(fan_in))."""
    dims = [input_dim] + list(hidden_dims) + [output_dim]
    params = {}
    for idx in range(1, len(dims)):
        fan_in, fan_out = dims[idx - 1], dims[idx]
        bound = 1.0 / jnp.sqrt(fan_in)
        key, kw, kb = jax.random.split(key, 3)
        params[f"w{idx}"] = jax.random.uniform(
            kw, (fan_in, fan_out), jnp.float32, -bound, bound)
        params[f"b{idx}"] = jax.random.uniform(
            kb, (1, fan_out), jnp.float32, -bound, bound)
    return params


def _reference_forward(z, params):
    h1 = jnp.maximum(z @ params["w1"] + params["b1"], 0.0)
    h2 = jnp.maximum(h1 @ params["w2"] + params["b2"], 0.0)
    return h2 @ params["w3"] + params["b3"]


if __name__ == "__main__":
    key = jax.random.PRNGKey(0)
    k_z, k_p = jax.random.split(key)

    B, D_IN, D_OUT = 16, 32, 16          # small demo shapes; hidden dims stay [256, 256]
    z = jax.random.normal(k_z, (B, D_IN), jnp.float32)
    params = init_decoder_params(k_p, D_IN, D_OUT, hidden_dims=(256, 256))

    ref = _reference_forward(z, params)

    # f32 path: exact structural check against the reference.
    prep_f32, d_out = prepare_decoder_params(params, use_bf16=False)
    out_f32 = jax.block_until_ready(decoder_forward(z, prep_f32, d_out))
    assert out_f32.shape == (B, D_OUT)
    assert jnp.allclose(out_f32, ref, atol=1e-4, rtol=1e-4), "f32 mismatch vs reference"

    # bf16-operand path (default, MXU-native): weights pre-cast ONCE, f32
    # accumulation in-kernel; tolerance loosened for the bf16 operand rounding.
    prep_bf16, d_out = prepare_decoder_params(params, use_bf16=True)
    out = jax.block_until_ready(decoder_forward(z, prep_bf16, d_out))
    assert out.shape == (B, D_OUT)
    assert jnp.allclose(out, ref, atol=2e-2, rtol=2e-2), "bf16 mismatch vs reference"

    # Exercise the multi-step 'parallel' grid path (ragged batch, >=2 tiles).
    B2 = 100
    z2 = jax.random.normal(k_z, (B2, D_IN), jnp.float32)
    ref2 = _reference_forward(z2, params)
    out2 = jax.block_until_ready(decoder_forward(z2, prep_bf16, d_out))
    assert out2.shape == (B2, D_OUT)
    assert jnp.allclose(out2, ref2, atol=2e-2, rtol=2e-2), "bf16 mismatch (large B)"

    print("KERNEL_OK")
</pallas_src>

<mosaic_0001>
module attributes {stable_mosaic.version = 11 : i64} {
  func.func @_decoder_kernel(%arg0: i32, %arg1: memref<16x32xf32, #tpu.memory_space<vmem>>, %arg2: memref<32x256xf32, #tpu.memory_space<vmem>>, %arg3: memref<1x256xf32, #tpu.memory_space<vmem>>, %arg4: memref<256x256xf32, #tpu.memory_space<vmem>>, %arg5: memref<1x256xf32, #tpu.memory_space<vmem>>, %arg6: memref<256x128xf32, #tpu.memory_space<vmem>>, %arg7: memref<1x128xf32, #tpu.memory_space<vmem>>, %arg8: memref<16x128xf32, #tpu.memory_space<vmem>>) attributes {dimension_semantics = [#tpu.dimension_semantics<parallel>], iteration_bounds = array<i64: 1>, scalar_prefetch = 0 : i64, scratch_operands = 0 : i64, tpu.core_type = #tpu.core_type<tc>, window_params = [{transform_indices = @transform_0, window_bounds = array<i64: 16, 32>}, {pipeline_mode = #tpu.pipeline_mode<synchronous>, transform_indices = @transform_1, window_bounds = array<i64: 32, 256>}, {pipeline_mode = #tpu.pipeline_mode<synchronous>, transform_indices = @transform_2, window_bounds = array<i64: 1, 256>}, {pipeline_mode = #tpu.pipeline_mode<synchronous>, transform_indices = @transform_3, window_bounds = array<i64: 256, 256>}, {pipeline_mode = #tpu.pipeline_mode<synchronous>, transform_indices = @transform_4, window_bounds = array<i64: 1, 256>}, {pipeline_mode = #tpu.pipeline_mode<synchronous>, transform_indices = @transform_5, window_bounds = array<i64: 256, 128>}, {pipeline_mode = #tpu.pipeline_mode<synchronous>, transform_indices = @transform_6, window_bounds = array<i64: 1, 128>}, {transform_indices = @transform_7, window_bounds = array<i64: 16, 128>}]} {
    %c0 = arith.constant 0 : index
    %c0_0 = arith.constant 0 : index
    %0 = vector.load %arg1[%c0, %c0_0] : memref<16x32xf32, #tpu.memory_space<vmem>>, vector<16x32xf32>
    %c0_1 = arith.constant 0 : index
    %c0_2 = arith.constant 0 : index
    %1 = vector.load %arg2[%c0_1, %c0_2] : memref<32x256xf32, #tpu.memory_space<vmem>>, vector<32x256xf32>
    %cst = arith.constant dense<0.000000e+00> : vector<16x256xf32>
    %2 = tpu.matmul %0, %1, %cst {dimension_numbers = #tpu.dot_dimension_numbers<[1], [0], [0], [1], [0, 0, 1, 1], [], []>} : vector<16x32xf32>, vector<32x256xf32>, vector<16x256xf32> -> vector<16x256xf32>
    %c0_3 = arith.constant 0 : index
    %c0_4 = arith.constant 0 : index
    %3 = vector.load %arg3[%c0_3, %c0_4] : memref<1x256xf32, #tpu.memory_space<vmem>>, vector<1x256xf32>
    %4 = vector.broadcast %3 : vector<1x256xf32> to vector<16x256xf32>
    %5 = arith.addf %2, %4 : vector<16x256xf32>
    %cst_5 = arith.constant 0.000000e+00 : f32
    %6 = vector.broadcast %cst_5 : f32 to vector<16x256xf32>
    %7 = arith.maximumf %5, %6 : vector<16x256xf32>
    %c0_6 = arith.constant 0 : index
    %c0_7 = arith.constant 0 : index
    %8 = vector.load %arg4[%c0_6, %c0_7] : memref<256x256xf32, #tpu.memory_space<vmem>>, vector<256x256xf32>
    %cst_8 = arith.constant dense<0.000000e+00> : vector<16x256xf32>
    %9 = tpu.matmul %7, %8, %cst_8 {dimension_numbers = #tpu.dot_dimension_numbers<[1], [0], [0], [1], [0, 0, 1, 1], [], []>} : vector<16x256xf32>, vector<256x256xf32>, vector<16x256xf32> -> vector<16x256xf32>
    %c0_9 = arith.constant 0 : index
    %c0_10 = arith.constant 0 : index
    %10 = vector.load %arg5[%c0_9, %c0_10] : memref<1x256xf32, #tpu.memory_space<vmem>>, vector<1x256xf32>
    %11 = vector.broadcast %10 : vector<1x256xf32> to vector<16x256xf32>
    %12 = arith.addf %9, %11 : vector<16x256xf32>
    %cst_11 = arith.constant 0.000000e+00 : f32
    %13 = vector.broadcast %cst_11 : f32 to vector<16x256xf32>
    %14 = arith.maximumf %12, %13 : vector<16x256xf32>
    %c0_12 = arith.constant 0 : index
    %c0_13 = arith.constant 0 : index
    %15 = vector.load %arg6[%c0_12, %c0_13] : memref<256x128xf32, #tpu.memory_space<vmem>>, vector<256x128xf32>
    %cst_14 = arith.constant dense<0.000000e+00> : vector<16x128xf32>
    %16 = tpu.matmul %14, %15, %cst_14 {dimension_numbers = #tpu.dot_dimension_numbers<[1], [0], [0], [1], [0, 0, 1, 1], [], []>} : vector<16x256xf32>, vector<256x128xf32>, vector<16x128xf32> -> vector<16x128xf32>
    %c0_15 = arith.constant 0 : index
    %c0_16 = arith.constant 0 : index
    %17 = vector.load %arg7[%c0_15, %c0_16] : memref<1x128xf32, #tpu.memory_space<vmem>>, vector<1x128xf32>
    %18 = vector.broadcast %17 : vector<1x128xf32> to vector<16x128xf32>
    %19 = arith.addf %16, %18 : vector<16x128xf32>
    %c0_17 = arith.constant 0 : index
    %c0_18 = arith.constant 0 : index
    %20 = vector.load %arg8[%c0_17, %c0_18] : memref<16x128xf32, #tpu.memory_space<vmem>>, vector<16x128xf32>
    tpu.vector_store %arg8[%c0_17, %c0_18], %19 {strides = array<i32>} : memref<16x128xf32, #tpu.memory_space<vmem>>, vector<16x128xf32>,
    return
  }
  func.func @transform_0(%arg0: i32) -> (i32, i32) {
    %c0_i32 = arith.constant 0 : i32
    %c0_i32_0 = arith.constant 0 : i32
    return %arg0, %c0_i32 : i32, i32
  }
  func.func @transform_1(%arg0: i32) -> (i32, i32) {
    %c0_i32 = arith.constant 0 : i32
    %c0_i32_0 = arith.constant 0 : i32
    %c0_i32_1 = arith.constant 0 : i32
    return %c0_i32, %c0_i32_0 : i32, i32
  }
  func.func @transform_2(%arg0: i32) -> (i32, i32) {
    %c0_i32 = arith.constant 0 : i32
    %c0_i32_0 = arith.constant 0 : i32
    %c0_i32_1 = arith.constant 0 : i32
    return %c0_i32, %c0_i32_0 : i32, i32
  }
  func.func @transform_3(%arg0: i32) -> (i32, i32) {
    %c0_i32 = arith.constant 0 : i32
    %c0_i32_0 = arith.constant 0 : i32
    %c0_i32_1 = arith.constant 0 : i32
    return %c0_i32, %c0_i32_0 : i32, i32
  }
  func.func @transform_4(%arg0: i32) -> (i32, i32) {
    %c0_i32 = arith.constant 0 : i32
    %c0_i32_0 = arith.constant 0 : i32
    %c0_i32_1 = arith.constant 0 : i32
    return %c0_i32, %c0_i32_0 : i32, i32
  }
  func.func @transform_5(%arg0: i32) -> (i32, i32) {
    %c0_i32 = arith.constant 0 : i32
    %c0_i32_0 = arith.constant 0 : i32
    %c0_i32_1 = arith.constant 0 : i32
    return %c0_i32, %c0_i32_0 : i32, i32
  }
  func.func @transform_6(%arg0: i32) -> (i32, i32) {
    %c0_i32 = arith.constant 0 : i32
    %c0_i32_0 = arith.constant 0 : i32
    %c0_i32_1 = arith.constant 0 : i32
    return %c0_i32, %c0_i32_0 : i32, i32
  }
  func.func @transform_7(%arg0: i32) -> (i32, i32) {
    %c0_i32 = arith.constant 0 : i32
    %c0_i32_0 = arith.constant 0 : i32
    return %arg0, %c0_i32 : i32, i32
  }
}

</mosaic_0001>

<bundles_post_ra>
// kernel: _decoder_forward_impl.1
= control target key start
LH: loop header
LB: loop body
LE: loop exit
PB: predicated region body
PF: predicated region fallthrough
CT: control target
= control target key end

     0   :  { %12 = vsyncpa [#allocation3], 0  ;;  %s701_s0 = inlined_call_operand.hbm [shape: f32[16,32], index: 0, kind: input, shape index: {}]   ;;  %s702_s1 = inlined_call_operand.hbm [shape: f32[32,256], index: 1, kind: input, shape index: {}]   ;;  %s703_s2 = inlined_call_operand.hbm [shape: f32[1,256], index: 2, kind: input, shape index: {}]   ;;  %s704_s3 = inlined_call_operand.hbm [shape: f32[256,256], index: 3, kind: input, shape index: {}]   ;;  %s705_s4 = inlined_call_operand.vmem [shape: f32[1,256], index: 4, kind: input, shape index: {}]   ;;  %s706_s5 = inlined_call_operand.hbm [shape: f32[256,128], index: 5, kind: input, shape index: {}]   ;;  %s707_s6 = inlined_call_operand.vmem [shape: f32[1,128], index: 6, kind: input, shape index: {}]   ;;  %s708_s7 = inlined_call_operand.hbm [shape: f32[16,128], index: 7, kind: output, shape index: {}]  }
   0x1   :  { %13 = vsyncpa [#allocation6], 0 }
   0x2   :  { %14 = vsyncpa [#allocation9], 0  ;;  %s33_s26 = sshll.u32 %s702_s1, 4  ;;  %s34_s26 = int_to_ptr.hbm [resolvable:$true] %s33_s26 }
   0x3   :  { %15 = vsyncpa [#allocation4], 0  ;;  %s614_s27 = smov [#allocation5]   ;;  %s57_s8 = sshll.u32 %s704_s3, 4  ;;  %s58_s8 = int_to_ptr.hbm [resolvable:$true] %s57_s8 }
   0x4   :  { %s35_s28 = sshll.u32 %s614_s27, 4  ;;  %s615_s9 = smov 256   ;;  %s36_s28 = int_to_ptr.vmem [resolvable:$true] %s35_s28 }
   0x5   :  { %s616_s10 = smov 16   ;;  %s617_s11 = smov [#allocation8]  }
   0x6   :  { %41 = dma.hbm_to_vmem [thread:$0]  %s34_s26, 1024, %s36_s28, [#allocation6], %s615_s9, %s615_s9, %s616_s10  }
   0x7   :  { %s59_s12 = sshll.u32 %s617_s11, 4  ;;  %s20_s15 = sshll.u32 %s701_s0, 4  ;;  %s60_s12 = int_to_ptr.vmem [resolvable:$true] %s59_s12  ;;  %s21_s15 = int_to_ptr.hbm [resolvable:$true] %s20_s15 }
   0x8   :  { %65 = dma.hbm_to_vmem [thread:$0]  %s58_s8, 8192, %s60_s12, [#allocation9], %s615_s9, %s615_s9, %s616_s10  }
   0x9   :  { %s618_s1 = smov [#allocation2]   ;;  %s47_s3 = sshll.u32 %s703_s2, 4  ;;  %s48_s3 = int_to_ptr.hbm [resolvable:$true] %s47_s3 }
   0xa   :  { %s22_s16 = sshll.u32 %s618_s1, 4  ;;  %s619_s19 = smov 128   ;;  %s23_s16 = int_to_ptr.vmem [resolvable:$true] %s22_s16 }
   0xb   :  { %s620_s20 = smov 8   ;;  %s621_s21 = smov [#allocation7]  }
   0xc   :  { %28 = dma.hbm_to_vmem [thread:$0]  %s21_s15, 256, %s23_s16, [#allocation3], %s619_s19, %s619_s19, %s620_s20  }
   0xd   :  { %s49_s22 = sshll.u32 %s621_s21, 4  ;;  %s72_s24 = sshll.u32 %s706_s5, 4  ;;  %s50_s22 = int_to_ptr.vmem [resolvable:$true] %s49_s22  ;;  %s73_s24 = int_to_ptr.hbm [resolvable:$true] %s72_s24 }
   0xe   :  { %52 = dma.hbm_to_vmem [thread:$0]  %s48_s3, 32, %s50_s22, [#allocation6]  }
   0xf   :  { %s622_s25 = smov [#allocation10]  }
  0x10   :  { %s74_s26 = sshll.u32 %s622_s25, 4  ;;  %s75_s26 = int_to_ptr.vmem [resolvable:$true] %s74_s26 }
  0x11   :  { %80 = dma.hbm_to_vmem [thread:$0]  %s73_s24, 4096, %s75_s26, [#allocation9], %s619_s19, %s619_s19, %s620_s20  }
  0x12   :  { %606 = dma.done.wait [#allocation3], 256  }
  0x13   :  { %607 = vsyncadd [#allocation3], 4294967040 }
  0x14   :  { %608 = dma.done.wait [#allocation6], 1056  }
  0x15   :  { %609 = vsyncadd [#allocation6], 4294966240 }
  0x16   :  { %610 = dma.done.wait [#allocation9], 12288  }
  0x17   :  { %611 = vsyncadd [#allocation9], 4294955008  ;;  %v111_v0 = vld [vmem:[#allocation5 + $0x30] sm:$0xff]  ;;  %v109_v1 = vld [vmem:[#allocation5 + $0x20] sm:$0xff]  ;;  %vm119_vm0 = vcmask 261120   ;;  %s623_s28 = smov [#allocation11]  }
  0x18   :  { %v112_v2 = vld [vmem:[#allocation5 + $0x38] sm:$0xff]  ;;  %138 = vmatpush.msra.mxu0 %v111_v0  ;;  %v110_v3 = vld [vmem:[#allocation5 + $0x28] sm:$0xff]  ;;  %v107_v4 = vld [vmem:[#allocation5 + $0x10] sm:$0xff]  ;;  %s430_s29 = sshll.u32 %s623_s28, 4  ;;  %s432_s9 = sshll.u32 %s708_s7, 4  ;;  %s431_s29 = int_to_ptr.vmem [resolvable:$true] %s430_s29  ;;  %s433_s9 = int_to_ptr.hbm [resolvable:$true] %s432_s9 }
  0x19   :  { %161 = vmatpush.msra.mxu1 %v112_v2  ;;  %v108_v5 = vld [vmem:[#allocation5 + $0x18] sm:$0xff]  ;;  %v105_v6 = vld [vmem:[#allocation5] sm:$0xff]  ;;  %v106_v8 = vld [vmem:[#allocation5 + $0x8] sm:$0xff] }
  0x1a   :  { %139 = vmatpush.msra.mxu0 %v109_v1  ;;  %v206_v7 = vld [vmem:[#allocation8 + $0xf0] sm:$0xff]  ;;  %v204_v9 = vld [vmem:[#allocation8 + $0xe0] sm:$0xff]  ;;  %v207_v12 = vld [vmem:[#allocation8 + $0xf8] sm:$0xff] }
  0x1b   :  { %162 = vmatpush.msra.mxu1 %v110_v3  ;;  %246 = vmatpush.msra.mxu2 %v206_v7  ;;  %v238_v10 = vld [vmem:[#allocation8 + $0x1f0] sm:$0xff]  ;;  %v239_v13 = vld [vmem:[#allocation8 + $0x1f8] sm:$0xff]  ;;  %v236_v15 = vld [vmem:[#allocation8 + $0x1e0] sm:$0xff] }
  0x1c   :  { %140 = vmatpush.msra.mxu0 %v107_v4  ;;  %v103_v11 = vld [vmem:[#allocation2] sm:$0xff]  ;;  %269 = vmatpush.msra.mxu3 %v238_v10  ;;  %v200_v18 = vld [vmem:[#allocation8 + $0xc0] sm:$0xff]  ;;  %v203_v20 = vld [vmem:[#allocation8 + $0xd8] sm:$0xff] }
  0x1d   :  { %163 = vmatpush.msra.mxu1 %v108_v5  ;;  %247 = vmatpush.msra.mxu2 %v204_v9  ;;  %v202_v14 = vld [vmem:[#allocation8 + $0xd0] sm:$0xff]  ;;  %v205_v16 = vld [vmem:[#allocation8 + $0xe8] sm:$0xff]  ;;  %v235_v21 = vld [vmem:[#allocation8 + $0x1d8] sm:$0xff] }
  0x1e   :  { %141 = vmatpush.msra.mxu0 %v105_v6  ;;  %v237_v17 = vld [vmem:[#allocation8 + $0x1e8] sm:$0xff]  ;;  %v234_v19 = vld [vmem:[#allocation8 + $0x1d0] sm:$0xff]  ;;  %270 = vmatpush.msra.mxu3 %v236_v15  ;;  %v232_v23 = vld [vmem:[#allocation8 + $0x1c0] sm:$0xff] }
  0x1f   :  { %164 = vmatpush.msra.mxu1 %v106_v8  ;;  %447 = vmatmul.msk.f32.vlgmr.msra.gmra.mxu0 %vm119_vm0, %v103_v11  ;;  %v198_v22 = vld [vmem:[#allocation8 + $0xb0] sm:$0xff]  ;;  %v201_v24 = vld [vmem:[#allocation8 + $0xc8] sm:$0xff]  ;;  %v199_v27 = vld [vmem:[#allocation8 + $0xb8] sm:$0xff] }
  0x20   :  { %449 = vmatmul.msk.f32.vlgmr.msra.gmra.mxu1 %vm119_vm0, %v103_v11  ;;  %292 = vmatpush.msrb.mxu0 %v207_v12  ;;  %v233_v25 = vld [vmem:[#allocation8 + $0x1c8] sm:$0xff]  ;;  %v104_v26 = vld [vmem:[#allocation2 + $0x8] sm:$0xff]  ;;  %v196_v28 = vld [vmem:[#allocation8 + $0xa0] sm:$0xff] }
  0x21   :  { %315 = vmatpush.msrb.mxu1 %v239_v13  ;;  %248 = vmatpush.msra.mxu2 %v202_v14  ;;  %v230_v29 = vld [vmem:[#allocation8 + $0x1b0] sm:$0xff]  ;;  %v231_v30 = vld [vmem:[#allocation8 + $0x1b8] sm:$0xff]  ;;  %v197_v31 = vld [vmem:[#allocation8 + $0xa8] sm:$0xff] }
  0x22   :  { %293 = vmatpush.msrb.mxu0 %v205_v16  ;;  %271 = vmatpush.msra.mxu3 %v234_v19  ;;  %v194_v32 = vld [vmem:[#allocation8 + $0x90] sm:$0xff]  ;;  %v228_v33 = vld [vmem:[#allocation8 + $0x1a0] sm:$0xff]  ;;  %v229_v34 = vld [vmem:[#allocation8 + $0x1a8] sm:$0xff] }
  0x23   :  { %316 = vmatpush.msrb.mxu1 %v237_v17  ;;  %249 = vmatpush.msra.mxu2 %v200_v18  ;;  %v195_v35 = vld [vmem:[#allocation8 + $0x98] sm:$0xff]  ;;  %v192_v36 = vld [vmem:[#allocation8 + $0x80] sm:$0xff]  ;;  %v226_v37 = vld [vmem:[#allocation8 + $0x190] sm:$0xff] }
  0x24   :  { %294 = vmatpush.msrb.mxu0 %v203_v20  ;;  %272 = vmatpush.msra.mxu3 %v232_v23  ;;  %v227_v38 = vld [vmem:[#allocation8 + $0x198] sm:$0xff]  ;;  %v193_v39 = vld [vmem:[#allocation8 + $0x88] sm:$0xff]  ;;  %v190_v40 = vld [vmem:[#allocation8 + $0x70] sm:$0xff] }
  0x25   :  { %317 = vmatpush.msrb.mxu1 %v235_v21  ;;  %250 = vmatpush.msra.mxu2 %v198_v22  ;;  %v224_v41 = vld [vmem:[#allocation8 + $0x180] sm:$0xff]  ;;  %v225_v42 = vld [vmem:[#allocation8 + $0x188] sm:$0xff]  ;;  %v191_v43 = vld [vmem:[#allocation8 + $0x78] sm:$0xff] }
  0x26   :  { %295 = vmatpush.msrb.mxu0 %v201_v24  ;;  %273 = vmatpush.msra.mxu3 %v230_v29  ;;  %v188_v44 = vld [vmem:[#allocation8 + $0x60] sm:$0xff]  ;;  %v222_v45 = vld [vmem:[#allocation8 + $0x170] sm:$0xff]  ;;  %v223_v46 = vld [vmem:[#allocation8 + $0x178] sm:$0xff] }
  0x27   :  { %318 = vmatpush.msrb.mxu1 %v233_v25  ;;  %448 = vmatmul.msk.f32.gmra.mxu0 %vm119_vm0, %v104_v26  ;;  %v189_v47 = vld [vmem:[#allocation8 + $0x68] sm:$0xff]  ;;  %v186_v48 = vld [vmem:[#allocation8 + $0x50] sm:$0xff]  ;;  %v220_v49 = vld [vmem:[#allocation8 + $0x160] sm:$0xff] }
  0x28   :  { %450 = vmatmul.msk.f32.gmra.mxu1 %vm119_vm0, %v104_v26  ;;  %296 = vmatpush.msrb.mxu0 %v199_v27  ;;  %v221_v50 = vld [vmem:[#allocation8 + $0x168] sm:$0xff]  ;;  %v187_v51 = vld [vmem:[#allocation8 + $0x58] sm:$0xff]  ;;  %v184_v52 = vld [vmem:[#allocation8 + $0x40] sm:$0xff] }
  0x29   :  { %251 = vmatpush.msra.mxu2 %v196_v28  ;;  %319 = vmatpush.msrb.mxu1 %v231_v30  ;;  %v218_v53 = vld [vmem:[#allocation8 + $0x150] sm:$0xff]  ;;  %v219_v54 = vld [vmem:[#allocation8 + $0x158] sm:$0xff]  ;;  %v185_v55 = vld [vmem:[#allocation8 + $0x48] sm:$0xff] }
  0x2a   :  { %297 = vmatpush.msrb.mxu0 %v197_v31  ;;  %274 = vmatpush.msra.mxu3 %v228_v33  ;;  %v182_v56 = vld [vmem:[#allocation8 + $0x30] sm:$0xff]  ;;  %v216_v57 = vld [vmem:[#allocation8 + $0x140] sm:$0xff]  ;;  %v217_v58 = vld [vmem:[#allocation8 + $0x148] sm:$0xff] }
  0x2b   :  { %252 = vmatpush.msra.mxu2 %v194_v32  ;;  %320 = vmatpush.msrb.mxu1 %v229_v34  ;;  %v183_v59 = vld [vmem:[#allocation8 + $0x38] sm:$0xff]  ;;  %v180_v60 = vld [vmem:[#allocation8 + $0x20] sm:$0xff]  ;;  %v214_v61 = vld [vmem:[#allocation8 + $0x130] sm:$0xff] }
  0x2c   :  { %298 = vmatpush.msrb.mxu0 %v195_v35  ;;  %275 = vmatpush.msra.mxu3 %v226_v37  ;;  %v181_v62 = vld [vmem:[#allocation8 + $0x28] sm:$0xff]  ;;  %v215_v63 = vld [vmem:[#allocation8 + $0x138] sm:$0xff]  ;;  %v178_v0 = vld [vmem:[#allocation8 + $0x10] sm:$0xff] }
  0x2d   :  { %253 = vmatpush.msra.mxu2 %v192_v36  ;;  %321 = vmatpush.msrb.mxu1 %v227_v38  ;;  %v212_v1 = vld [vmem:[#allocation8 + $0x120] sm:$0xff]  ;;  %v179_v2 = vld [vmem:[#allocation8 + $0x18] sm:$0xff]  ;;  %v213_v3 = vld [vmem:[#allocation8 + $0x128] sm:$0xff] }
  0x2e   :  { %299 = vmatpush.msrb.mxu0 %v193_v39  ;;  %276 = vmatpush.msra.mxu3 %v224_v41  ;;  %v176_v4 = vld [vmem:[#allocation8] sm:$0xff]  ;;  %v210_v5 = vld [vmem:[#allocation8 + $0x110] sm:$0xff]  ;;  %v177_v6 = vld [vmem:[#allocation8 + $0x8] sm:$0xff] }
  0x2f   :  { %254 = vmatpush.msra.mxu2 %v190_v40  ;;  %322 = vmatpush.msrb.mxu1 %v225_v42  ;;  %v211_v7 = vld [vmem:[#allocation8 + $0x118] sm:$0xff]  ;;  %v208_v8 = vld [vmem:[#allocation8 + $0x100] sm:$0xff]  ;;  %v209_v9 = vld [vmem:[#allocation8 + $0x108] sm:$0xff] }
  0x30   :  { %300 = vmatpush.msrb.mxu0 %v191_v43  ;;  %277 = vmatpush.msra.mxu3 %v222_v45  ;;  %v373_v10 = vld [vmem:[#allocation10 + $0xf8] sm:$0xff]  ;;  %v372_v11 = vld [vmem:[#allocation10 + $0xf0] sm:$0xff]  ;;  %v371_v14 = vld [vmem:[#allocation10 + $0xe8] sm:$0xff] }
  0x31   :  { %255 = vmatpush.msra.mxu2 %v188_v44  ;;  %323 = vmatpush.msrb.mxu1 %v223_v46  ;;  %v357_v12 = vld [vmem:[#allocation10 + $0x78] sm:$0xff]  ;;  %v356_v13 = vld [vmem:[#allocation10 + $0x70] sm:$0xff]  ;;  %v355_v15 = vld [vmem:[#allocation10 + $0x68] sm:$0xff] }
  0x32   :  { %301 = vmatpush.msrb.mxu0 %v189_v47  ;;  %278 = vmatpush.msra.mxu3 %v220_v49  ;;  %v370_v16 = vld [vmem:[#allocation10 + $0xe0] sm:$0xff]  ;;  %v369_v18 = vld [vmem:[#allocation10 + $0xd8] sm:$0xff]  ;;  %v368_v20 = vld [vmem:[#allocation10 + $0xd0] sm:$0xff] }
  0x33   :  { %256 = vmatpush.msra.mxu2 %v186_v48  ;;  %324 = vmatpush.msrb.mxu1 %v221_v50  ;;  %v354_v17 = vld [vmem:[#allocation10 + $0x60] sm:$0xff]  ;;  %v353_v19 = vld [vmem:[#allocation10 + $0x58] sm:$0xff]  ;;  %v352_v21 = vld [vmem:[#allocation10 + $0x50] sm:$0xff] }
  0x34   :  { %302 = vmatpush.msrb.mxu0 %v187_v51  ;;  %279 = vmatpush.msra.mxu3 %v218_v53  ;;  %v367_v22 = vld [vmem:[#allocation10 + $0xc8] sm:$0xff]  ;;  %v113_v24 = vld [vmem:[#allocation7] sm:$0x3]  ;;  %v366_v25 = vld [vmem:[#allocation10 + $0xc0] sm:$0xff] }
  0x35   :  { %257 = vmatpush.msra.mxu2 %v184_v52  ;;  %325 = vmatpush.msrb.mxu1 %v219_v54  ;;  %v351_v23 = vld [vmem:[#allocation10 + $0x48] sm:$0xff]  ;;  %v350_v26 = vld [vmem:[#allocation10 + $0x40] sm:$0xff]  ;;  %v365_v27 = vld [vmem:[#allocation10 + $0xb8] sm:$0xff]  ;;  %v115_v28 = vperm.slane %v113_v24, 0  ;;  %v116_v29 = vperm.slane %v113_v24, 1 }
  0x36   :  { %303 = vmatpush.msrb.mxu0 %v185_v55  ;;  %280 = vmatpush.msra.mxu3 %v216_v57  ;;  %v349_v30 = vld [vmem:[#allocation10 + $0x38] sm:$0xff]  ;;  %v364_v31 = vld [vmem:[#allocation10 + $0xb0] sm:$0xff]  ;;  %v363_v34 = vld [vmem:[#allocation10 + $0xa8] sm:$0xff] }
  0x37   :  { %258 = vmatpush.msra.mxu2 %v182_v56  ;;  %326 = vmatpush.msrb.mxu1 %v217_v58  ;;  %v362_v39 = vld [vmem:[#allocation10 + $0xa0] sm:$0xff]  ;;  %v348_v46 = vld [vmem:[#allocation10 + $0x30] sm:$0xff]  ;;  %v361_v47 = vld [vmem:[#allocation10 + $0x98] sm:$0xff] }
  0x38   :  { %304 = vmatpush.msrb.mxu0 %v183_v59  ;;  %281 = vmatpush.msra.mxu3 %v214_v61  ;;  %v347_v48 = vld [vmem:[#allocation10 + $0x28] sm:$0xff]  ;;  %v360_v49 = vld [vmem:[#allocation10 + $0x90] sm:$0xff]  ;;  %v346_v50 = vld [vmem:[#allocation10 + $0x20] sm:$0xff] }
  0x39   :  { %259 = vmatpush.msra.mxu2 %v180_v60  ;;  %327 = vmatpush.msrb.mxu1 %v215_v63  ;;  %v359_v51 = vld [vmem:[#allocation10 + $0x88] sm:$0xff]  ;;  %v345_v52 = vld [vmem:[#allocation10 + $0x18] sm:$0xff]  ;;  %v358_v53 = vld [vmem:[#allocation10 + $0x80] sm:$0xff] }
  0x3a   :  { %305 = vmatpush.msrb.mxu0 %v181_v62  ;;  %282 = vmatpush.msra.mxu3 %v212_v1  ;;  %v344_v54 = vld [vmem:[#allocation10 + $0x10] sm:$0xff]  ;;  %v343_v55 = vld [vmem:[#allocation10 + $0x8] sm:$0xff]  ;;  %v342_v56 = vld [vmem:[#allocation10] sm:$0xff] }
  0x3b   :  { %260 = vmatpush.msra.mxu2 %v178_v0  ;;  %328 = vmatpush.msrb.mxu1 %v213_v3  ;;  %v240_v57 = vld [vmem:[%s705_s4] sm:$0x3] }
  0x3c   :  { %306 = vmatpush.msrb.mxu0 %v179_v2  ;;  %283 = vmatpush.msra.mxu3 %v210_v5  ;;  %v243_v58 = vperm.slane %v240_v57, 1  ;;  %v242_v63 = vperm.slane %v240_v57, 0 }
  0x3d   :  { %261 = vmatpush.msra.mxu2 %v176_v4  ;;  %329 = vmatpush.msrb.mxu1 %v211_v7 }
  0x3e   :  { %307 = vmatpush.msrb.mxu0 %v177_v6  ;;  %284 = vmatpush.msra.mxu3 %v208_v8 }
  0x3f   :  { %330 = vmatpush.msrb.mxu1 %v209_v9  ;;  %378 = vmatpush.msrb.mxu2 %v357_v12 }
  0x40   :  { %401 = vmatpush.msrb.mxu3 %v373_v10 }
  0x41   :  { %379 = vmatpush.msrb.mxu2 %v356_v13 }
  0x42   :  { %402 = vmatpush.msrb.mxu3 %v372_v11 }
  0x43   :  { %380 = vmatpush.msrb.mxu2 %v355_v15 }
  0x44   :  { %403 = vmatpush.msrb.mxu3 %v371_v14 }
  0x45   :  { %381 = vmatpush.msrb.mxu2 %v354_v17 }
  0x46   :  { %404 = vmatpush.msrb.mxu3 %v370_v16  ;;  %v461_v16 = vld [vmem:[%s707_s6] ss:$0 sm:$0xff] }
  0x47   :  { %382 = vmatpush.msrb.mxu2 %v353_v19 }
  0x48   :  { %405 = vmatpush.msrb.mxu3 %v369_v18 }
  0x49   :  { %383 = vmatpush.msrb.mxu2 %v352_v21 }
  0x4a   :  { %406 = vmatpush.msrb.mxu3 %v368_v20 }
  0x4b   :  { %384 = vmatpush.msrb.mxu2 %v351_v23 }
  0x4c   :  { %407 = vmatpush.msrb.mxu3 %v367_v22 }
  0x4d   :  { %385 = vmatpush.msrb.mxu2 %v350_v26 }
  0x4e   :  { %408 = vmatpush.msrb.mxu3 %v366_v25 }
  0x4f   :  { %386 = vmatpush.msrb.mxu2 %v349_v30 }
  0x50   :  { %409 = vmatpush.msrb.mxu3 %v365_v27 }
  0x51   :  { %387 = vmatpush.msrb.mxu2 %v348_v46 }
  0x52   :  { %410 = vmatpush.msrb.mxu3 %v364_v31 }
  0x53   :  { %388 = vmatpush.msrb.mxu2 %v347_v48 }
  0x54   :  { %411 = vmatpush.msrb.mxu3 %v363_v34 }
  0x55   :  { %389 = vmatpush.msrb.mxu2 %v346_v50 }
  0x56   :  { %412 = vmatpush.msrb.mxu3 %v362_v39 }
  0x57   :  { %390 = vmatpush.msrb.mxu2 %v345_v52 }
  0x58   :  { %413 = vmatpush.msrb.mxu3 %v361_v47 }
  0x59   :  { %391 = vmatpush.msrb.mxu2 %v344_v54 }
  0x5a   :  { %414 = vmatpush.msrb.mxu3 %v360_v49 }
  0x5b   :  { %392 = vmatpush.msrb.mxu2 %v343_v55 }
  0x5c   :  { %415 = vmatpush.msrb.mxu3 %v359_v51 }
  0x5d   :  { %393 = vmatpush.msrb.mxu2 %v342_v56 }
  0x5e   :  { %416 = vmatpush.msrb.mxu3 %v358_v53 }
  0x9c   :  { %v143_v32 = vpop.f32.mrf.mxu0 }
  0x9d   :  { %v166_v33 = vpop.f32.mrf.mxu1  ;;  %v144_v35 = vadd.f32 %v143_v32, %v115_v28 }
  0x9e   :  { %v167_v36 = vadd.f32 %v166_v33, %v116_v29 }
  0x9f   :  { %v172_v37 = vmax.f32 %v144_v35, 0.0 }
  0xa0   :  { %v173_v38 = vmax.f32 %v167_v36, 0.0 }
  0xa1   :  { %262 = vmatmul.f32.vlgmr.msra.gmra.mxu2 %v172_v37  ;;  %308 = vmatmul.f32.vlgmr.msrb.gmra.mxu0 %v172_v37 }
  0xa2   :  { %285 = vmatmul.f32.vlgmr.msra.gmra.mxu3 %v173_v38  ;;  %331 = vmatmul.f32.vlgmr.msrb.gmra.mxu1 %v173_v38 }
  0xa4   :  { %v146_v40 = vpop.f32.mrf.mxu0 }
  0xa5   :  { %v169_v41 = vpop.f32.mrf.mxu1  ;;  %v147_v42 = vadd.f32 %v146_v40, %v115_v28 }
  0xa6   :  { %v170_v43 = vadd.f32 %v169_v41, %v116_v29 }
  0xa7   :  { %v174_v44 = vmax.f32 %v147_v42, 0.0 }
  0xa8   :  { %v175_v45 = vmax.f32 %v170_v43, 0.0 }
  0xa9   :  { %265 = vmatmul.f32.gmra.mxu2 %v174_v44  ;;  %311 = vmatmul.f32.gmra.mxu0 %v174_v44 }
  0xaa   :  { %288 = vmatmul.f32.gmra.mxu3 %v175_v45  ;;  %334 = vmatmul.f32.gmra.mxu1 %v175_v45 }
 0x11e   :  { %v309_v59 = vpop.f32.mrf.mxu0 }
 0x11f   :  { %v310_v60 = vadd.f32 %v309_v59, %v243_v58  ;;  %v332_v61 = vpop.f32.mrf.mxu1 }
 0x121   :  { %v333_v62 = vadd.f32 %v332_v61, %v310_v60 }
 0x123   :  { %v339_v0 = vmax.f32 %v333_v62, 0.0 }
 0x124   :  { %v263_v1 = vpop.f32.mrf.mxu2 }
 0x125   :  { %v264_v2 = vadd.f32 %v263_v1, %v242_v63  ;;  %417 = vmatmul.f32.vlgmr.msrb.gmra.mxu3 %v339_v0  ;;  %v286_v3 = vpop.f32.mrf.mxu3 }
 0x126   :  { %v312_v4 = vpop.f32.mrf.mxu0 }
 0x127   :  { %v287_v5 = vadd.f32 %v286_v3, %v264_v2  ;;  %v313_v6 = vadd.f32 %v312_v4, %v243_v58  ;;  %v335_v7 = vpop.f32.mrf.mxu1 }
 0x129   :  { %v338_v8 = vmax.f32 %v287_v5, 0.0  ;;  %v336_v9 = vadd.f32 %v335_v7, %v313_v6 }
 0x12b   :  { %v341_v10 = vmax.f32 %v336_v9, 0.0  ;;  %394 = vmatmul.f32.vlgmr.msrb.gmra.mxu2 %v338_v8 }
 0x12c   :  { %v266_v11 = vpop.f32.mrf.mxu2 }
 0x12d   :  { %v267_v12 = vadd.f32 %v266_v11, %v242_v63  ;;  %420 = vmatmul.f32.gmra.mxu3 %v341_v10  ;;  %v289_v13 = vpop.f32.mrf.mxu3 }
 0x12f   :  { %v290_v14 = vadd.f32 %v289_v13, %v267_v12 }
 0x131   :  { %v340_v15 = vmax.f32 %v290_v14, 0.0 }
 0x133   :  { %397 = vmatmul.f32.gmra.mxu2 %v340_v15 }
 0x1a8   :  { %v418_v17 = vpop.f32.mrf.mxu3 }
 0x1ae   :  { %v395_v18 = vpop.f32.mrf.mxu2 }
 0x1af   :  { %v396_v19 = vadd.f32 %v461_v16, %v395_v18 }
 0x1b0   :  { %v421_v23 = vpop.f32.mrf.mxu3 }
 0x1b1   :  { %v419_v20 = vadd.f32 %v418_v17, %v396_v19 }
 0x1b3   :  { %424 = vst [vmem:[#allocation11] sm:$0xff] %v419_v20 }
 0x1b6   :  { %v398_v21 = vpop.f32.mrf.mxu2 }
 0x1b7   :  { %v399_v22 = vadd.f32 %v461_v16, %v398_v21 }
 0x1b9   :  { %v422_v24 = vadd.f32 %v421_v23, %v399_v22 }
 0x1bb   :  { %425 = vst [vmem:[#allocation11 + $0x8] sm:$0xff] %v422_v24 }
 0x1bc   :  { %438 = dma.vmem_to_hbm [thread:$0]  %s431_s29, 256, %s433_s9, [#allocation4], %s619_s19, %s619_s19, %s620_s20  }
 0x1bd   :  { %612 = dma.done.wait [#allocation4], 256  }
 0x1be   :  { %613 = vsyncadd [#allocation4], 4294967040 }
 0x1bf   :  { %443 = vsyncpa [#allocation3], 1 }
 0x1c0   :  { %444 = vsyncpa [#allocation6], 1 }
 0x1c1   :  { %445 = vsyncpa [#allocation9], 1 }
 0x1c2   :  { %446 = vsyncpa [#allocation4], 1 }

</bundles_post_ra>
